<compile_context>
chip_gen: v6e
topology: v6e:2x2x1
jax: 0.10.0
libtpu: 0.0.40
codegen_flags: <defaults>
</compile_context>

<pallas_src>
import jax
import jax.numpy as jnp
from jax import lax
from jax.experimental import pallas as pl
from jax.experimental.pallas import tpu as pltpu


# ----------------------------------------------------------------------------
# set_local_anchor: deterministic "parameters" of the module (plain JAX glue).
# ----------------------------------------------------------------------------
def make_local_anchor(sizes=(128, 256, 512), aspect_ratios=(0.5, 1.0, 2.0)):
    # Always float32: low-precision sqrt/ratio math would diverge from PyTorch.
    sizes = jnp.asarray(sizes, dtype=jnp.float32)
    ar = jnp.asarray(aspect_ratios, dtype=jnp.float32)
    height_ratio = jnp.sqrt(ar)
    width_ratio = 1.0 / height_ratio
    height = (height_ratio[:, None] * sizes[None, :]).reshape(-1)
    width = (width_ratio[:, None] * sizes[None, :]).reshape(-1)
    local = jnp.stack([-width, -height, width, height], axis=1) / 2.0
    return jnp.round(local)  # (K, 4), round-half-to-even like torch.round


# ----------------------------------------------------------------------------
# Generation-aware knobs (tile target + Pallas/XLA crossover).
# ----------------------------------------------------------------------------
def _tpu_generation_params():
    try:
        kind = jax.devices()[0].device_kind.lower()
    except Exception:  # pragma: no cover - CPU/interpret fallback
        kind = ""
    if "v5" in kind:
        # v5e: 16 MiB default scoped VMEM, ~820 GB/s HBM -> gains saturate early.
        return {"target_bytes": 1536 * 1024, "small_elems": 256 * 1024}
    if "v6" in kind:
        # v6e: 32 MiB scoped / 128 MiB physical VMEM.
        return {"target_bytes": 3 * 1024 * 1024, "small_elems": 512 * 1024}
    # v7x / unknown: 64 MiB physical VMEM, fastest HBM -> highest XLA-fallback bar.
    return {"target_bytes": 3 * 1024 * 1024, "small_elems": 1024 * 1024}


def _round_up(x, m):
    return ((x + m - 1) // m) * m


def _cdiv(a, b):
    return -(-a // b)


def _choose_tile_rows(gh, row_bytes, *, target_bytes, min_steps=4):
    """Row-tile chooser: big blocks (amortize ~0.35us/step), >= min_steps grid
    steps when gh allows it (v7x 2-TC sharding + pipeline overlap), prefer a
    tile that divides gh evenly, always a multiple of 8 rows (or full gh)."""
    t = max(8, (target_bytes // max(row_bytes, 1)) // 8 * 8)
    if gh >= min_steps * 8:
        cap = max(8, _round_up(_cdiv(gh, min_steps), 8))
        t = min(t, cap)
    if t >= gh:
        return gh
    n_steps = _cdiv(gh, t)
    even = _cdiv(gh, n_steps)
    if even % 8 == 0:           # uniform blocks, no ragged masked tail
        t = even
    return t


# ----------------------------------------------------------------------------
# Pallas kernel: out[r, q] = (base[0, q] + i0*y_step[0, q]) + r * y_step[0, q]
# ----------------------------------------------------------------------------
def _global_anchor_kernel(base_ref, ystep_ref, out_ref):
    tile_rows = out_ref.shape[0]
    ystep = ystep_ref[...]                                    # (1, L), resident
    i0 = (pl.program_id(0) * tile_rows).astype(jnp.float32)   # scalar, once/block
    base_eff = base_ref[...] + i0 * ystep                     # (1, L): tiny fold
    row = lax.broadcasted_iota(jnp.int32, out_ref.shape, 0).astype(jnp.float32)
    out_ref[...] = base_eff + row * ystep                     # HBM-store bound


def global_anchor_pallas(local_anchor, grid_size, stride, *, tile_rows=None):
    K = local_anchor.shape[0]
    gh, gw = int(grid_size[0]), int(grid_size[1])
    sh, sw = float(stride[0]), float(stride[1])
    L = gw * 4 * K  # lane dimension of the output slab

    local = local_anchor.astype(jnp.float32)

    # base[j, k, c] = j*stride_w on x coords + local[k, c]   -> (1, L)
    x_shift = jnp.arange(gw, dtype=jnp.float32) * sw
    x_mask = jnp.asarray([1.0, 0.0, 1.0, 0.0], jnp.float32)
    base = (local[None, :, :] + x_shift[:, None, None] * x_mask[None, None, :]).reshape(1, L)
    # y_step[j, k, c] = stride_h on y coords, 0 on x coords  -> (1, L)
    y_step = jnp.tile(jnp.asarray([0.0, 1.0, 0.0, 1.0], jnp.float32) * sh, gw * K).reshape(1, L)

    if tile_rows is None:
        params = _tpu_generation_params()
        tile_rows = _choose_tile_rows(gh, L * 4, target_bytes=params["target_bytes"])
    else:
        tile_rows = int(tile_rows)
        if tile_rows < gh:
            tile_rows = max(8, (tile_rows // 8) * 8)   # (8,128) block constraint
        if tile_rows >= gh:
            tile_rows = gh

    grid = (pl.cdiv(gh, tile_rows),)

    out = pl.pallas_call(
        _global_anchor_kernel,
        out_shape=jax.ShapeDtypeStruct((gh, L), jnp.float32),
        grid=grid,
        in_specs=[pl.BlockSpec((1, L), lambda b: (0, 0)),    # base: resident
                  pl.BlockSpec((1, L), lambda b: (0, 0))],   # y_step: resident
        out_specs=pl.BlockSpec((tile_rows, L), lambda b: (b, 0)),
        compiler_params=pltpu.CompilerParams(dimension_semantics=("parallel",)),
    )(base, y_step)

    # (gh, gw*K*4) -> (gh*gw*K, 4): contiguous row-major reshape (metadata only).
    return out.reshape(gh * gw * K, 4)


# ----------------------------------------------------------------------------
# Fused-XLA path for tiny grids (pallas_call launch overhead would dominate).
# ----------------------------------------------------------------------------
def global_anchor_xla(local_anchor, grid_size, stride):
    gh, gw = int(grid_size[0]), int(grid_size[1])
    shift_h = jnp.arange(gh, dtype=jnp.float32) * float(stride[0])
    shift_w = jnp.arange(gw, dtype=jnp.float32) * float(stride[1])
    SH, SW = jnp.meshgrid(shift_h, shift_w, indexing="ij")
    SH, SW = SH.reshape(-1), SW.reshape(-1)
    shifts = jnp.stack((SW, SH, SW, SH), axis=1)
    return (shifts[:, None, :] + local_anchor.astype(jnp.float32)[None, :, :]).reshape(-1, 4)


def anchor_gener_forward(images, image_sizes, feature_map,
                         sizes=(128, 256, 512), aspect_ratios=(0.5, 1.0, 2.0),
                         use_pallas=None, tile_rows=None):
    """Equivalent of AnchorGener.forward(image_list, feature_map)."""
    image_size = images.shape[-2:]
    grid_size = feature_map.shape[-2:]
    stride = (image_size[0] // grid_size[0], image_size[1] // grid_size[1])
    local = make_local_anchor(sizes, aspect_ratios)

    n_elems = int(grid_size[0]) * int(grid_size[1]) * local.shape[0] * 4
    if use_pallas is None:
        use_pallas = n_elems >= _tpu_generation_params()["small_elems"]

    if use_pallas:
        anchors_on_fm = global_anchor_pallas(local, grid_size, stride, tile_rows=tile_rows)
    else:
        anchors_on_fm = global_anchor_xla(local, grid_size, stride)

    # one (identical) anchor set per image in the batch, as in the PyTorch module
    # TODO(synk): anchor_cache / ImageList bookkeeping is host-side glue, not kernel work.
    return [anchors_on_fm for _ in range(len(image_sizes))]


if __name__ == "__main__":
    key = jax.random.PRNGKey(0)
    k1, k2 = jax.random.split(key)

    # small shapes consistent with the forward: batch=2, 32x32 images, 8x8 feature map
    images = jax.random.normal(k1, (2, 3, 32, 32), dtype=jnp.float32)      # NCHW
    feature_map = jax.random.normal(k2, (2, 4, 8, 8), dtype=jnp.float32)   # NCHW
    image_sizes = [(32, 32), (32, 32)]

    local = make_local_anchor()

    # 1) forward pass, forcing the Pallas path on the toy 8x8 grid
    anchors = anchor_gener_forward(images, image_sizes, feature_map, use_pallas=True)
    for a in anchors:
        jax.block_until_ready(a)
    ref = global_anchor_xla(local, (8, 8), (4, 4))
    assert len(anchors) == 2
    assert anchors[0].shape == ref.shape == (8 * 8 * 9, 4)
    assert bool(jnp.array_equal(anchors[0], ref))

    # 2) multi-tile grid, auto tile selection (>= 4 parallel grid steps)
    gs2, st2 = (32, 16), (8, 8)
    out2 = global_anchor_pallas(local, gs2, st2)
    jax.block_until_ready(out2)
    assert bool(jnp.array_equal(out2, global_anchor_xla(local, gs2, st2)))

    # 3) ragged final block (gh not a multiple of tile_rows -> masked writeback)
    gs3, st3 = (20, 16), (8, 8)
    out3 = global_anchor_pallas(local, gs3, st3, tile_rows=8)
    jax.block_until_ready(out3)
    assert bool(jnp.array_equal(out3, global_anchor_xla(local, gs3, st3)))

    # 4) auto path (tiny grid -> fused XLA fallback) agrees with the reference
    anchors_auto = anchor_gener_forward(images, image_sizes, feature_map)
    assert bool(jnp.array_equal(anchors_auto[0], ref))

    print("KERNEL_OK")
</pallas_src>

<mosaic_0001>
module attributes {stable_mosaic.version = 11 : i64} {
  func.func @_global_anchor_kernel(%arg0: i32, %arg1: memref<1x288xf32, #tpu.memory_space<vmem>>, %arg2: memref<1x288xf32, #tpu.memory_space<vmem>>, %arg3: memref<8x288xf32, #tpu.memory_space<vmem>>) attributes {dimension_semantics = [#tpu.dimension_semantics<parallel>], iteration_bounds = array<i64: 1>, scalar_prefetch = 0 : i64, scratch_operands = 0 : i64, tpu.core_type = #tpu.core_type<tc>, window_params = [{pipeline_mode = #tpu.pipeline_mode<synchronous>, transform_indices = @transform_0, window_bounds = array<i64: 1, 288>}, {pipeline_mode = #tpu.pipeline_mode<synchronous>, transform_indices = @transform_1, window_bounds = array<i64: 1, 288>}, {transform_indices = @transform_2, window_bounds = array<i64: 8, 288>}]} {
    %c0 = arith.constant 0 : index
    %c0_0 = arith.constant 0 : index
    %0 = vector.load %arg2[%c0, %c0_0] : memref<1x288xf32, #tpu.memory_space<vmem>>, vector<1x288xf32>
    %c8_i32 = arith.constant 8 : i32
    %1 = arith.muli %arg0, %c8_i32 : i32
    %2 = arith.sitofp %1 : i32 to f32
    %c0_1 = arith.constant 0 : index
    %c0_2 = arith.constant 0 : index
    %3 = vector.load %arg1[%c0_1, %c0_2] : memref<1x288xf32, #tpu.memory_space<vmem>>, vector<1x288xf32>
    %4 = vector.broadcast %2 : f32 to vector<1x288xf32>
    %5 = arith.mulf %4, %0 : vector<1x288xf32>
    %6 = arith.addf %3, %5 : vector<1x288xf32>
    %7 = tpu.iota {dimensions = array<i32: 0>} : vector<8x288xi32>
    %8 = arith.sitofp %7 : vector<8x288xi32> to vector<8x288xf32>
    %9 = vector.broadcast %0 : vector<1x288xf32> to vector<8x288xf32>
    %10 = arith.mulf %8, %9 : vector<8x288xf32>
    %11 = vector.broadcast %6 : vector<1x288xf32> to vector<8x288xf32>
    %12 = arith.addf %11, %10 : vector<8x288xf32>
    %c0_3 = arith.constant 0 : index
    %c0_4 = arith.constant 0 : index
    %13 = vector.load %arg3[%c0_3, %c0_4] : memref<8x288xf32, #tpu.memory_space<vmem>>, vector<8x288xf32>
    tpu.vector_store %arg3[%c0_3, %c0_4], %12 {strides = array<i32>} : memref<8x288xf32, #tpu.memory_space<vmem>>, vector<8x288xf32>,
    return
  }
  func.func @transform_0(%arg0: i32) -> (i32, i32) {
    %c0_i32 = arith.constant 0 : i32
    %c0_i32_0 = arith.constant 0 : i32
    %c0_i32_1 = arith.constant 0 : i32
    return %c0_i32, %c0_i32_0 : i32, i32
  }
  func.func @transform_1(%arg0: i32) -> (i32, i32) {
    %c0_i32 = arith.constant 0 : i32
    %c0_i32_0 = arith.constant 0 : i32
    %c0_i32_1 = arith.constant 0 : i32
    return %c0_i32, %c0_i32_0 : i32, i32
  }
  func.func @transform_2(%arg0: i32) -> (i32, i32) {
    %c0_i32 = arith.constant 0 : i32
    %c0_i32_0 = arith.constant 0 : i32
    return %arg0, %c0_i32 : i32, i32
  }
}

</mosaic_0001>

<bundles_post_ra>
// kernel: tpu_custom_call.1
= control target key start
LH: loop header
LB: loop body
LE: loop exit
PB: predicated region body
PF: predicated region fallthrough
CT: control target
= control target key end

     0   :  { %7 = vsyncpa [#allocation3], 0  ;;  %s200_s0 = inlined_call_operand.hbm [shape: f32[1,288], index: 0, kind: input, shape index: {}]   ;;  %s201_s1 = inlined_call_operand.hbm [shape: f32[1,288], index: 1, kind: input, shape index: {}]   ;;  %s202_s2 = inlined_call_operand.hbm [shape: f32[8,288], index: 2, kind: output, shape index: {}]  }
   0x1   :  { %8 = vsyncpa [#allocation6], 0 }
   0x2   :  { %9 = vsyncpa [#allocation4], 0  ;;  %s173_s9 = smov [#allocation2]   ;;  %s174_s11 = smov [#allocation5]  }
   0x3   :  { %s16_s10 = sshll.u32 %s173_s9, 4  ;;  %s26_s12 = sshll.u32 %s174_s11, 4  ;;  %s17_s10 = int_to_ptr.vmem [resolvable:$true] %s16_s10  ;;  %s27_s12 = int_to_ptr.vmem [resolvable:$true] %s26_s12 }
   0x4   :  { %s115_s13 = scalar_lea.vmem %s17_s10, 48  ;;  %s119_s14 = scalar_lea.vmem %s17_s10, 64 }
   0x5   :  { %p116_p0 = scmp.ne.s32.totalorder %s17_s10, %s115_s13  ;;  %p120_p1 = scmp.lt.s32.totalorder %s17_s10, %s17_s10 }
   0x6   :  { %p121_p2 = scmp.lt.s32.totalorder %s119_s14, %s115_s13 }
   0x8   :  { %p122_p3 = por %p121_p2, %p120_p1 }
   0xa   :  { %p123_p4 = pnand %p122_p3, %p116_p0 }
   0xc   :  { %126 = shalt.err (!%p123_p4)
}
   0xd   :  { %19 = dma.hbm_to_vmem [thread:$0]  %s200_s0, 48, %s17_s10, [#allocation3]  }
   0xe   :  { %s135_s17 = scalar_lea.vmem %s27_s12, 48  ;;  %s139_s18 = scalar_lea.vmem %s27_s12, 64 }
   0xf   :  { %p136_p5 = scmp.ne.s32.totalorder %s27_s12, %s135_s17  ;;  %p140_p6 = scmp.lt.s32.totalorder %s27_s12, %s27_s12 }
  0x10   :  { %p141_p7 = scmp.lt.s32.totalorder %s139_s18, %s135_s17 }
  0x12   :  { %p142_p8 = por %p141_p7, %p140_p6 }
  0x14   :  { %p143_p9 = pnand %p142_p8, %p136_p5 }
  0x16   :  { %146 = shalt.err (!%p143_p9)
}
  0x17   :  { %29 = dma.hbm_to_vmem [thread:$0]  %s201_s1, 48, %s27_s12, [#allocation6]  }
  0x18   :  { %167 = dma.done.wait [#allocation3], 48  }
  0x19   :  { %168 = vsyncadd [#allocation3], 4294967248 }
  0x1a   :  { %169 = dma.done.wait [#allocation6], 48  }
  0x1b   :  { %170 = vsyncadd [#allocation6], 4294967248  ;;  %v43_v0 = vlaneseq  ;;  %v36_v6 = vld [vmem:[#allocation5] sm:$0x7]  ;;  %v39_v7 = vld [vmem:[#allocation2] sm:$0x7] }
  0x1c   :  { %v41_v8 = vmul.f32 0.0, %v36_v6  ;;  %s175_s0 = smov [#allocation7]   ;;  %vm86_vm0 = vcmask 261120  }
  0x1d   :  { %v44_v1 = vshrl.u32 %v43_v0, 7  ;;  %s94_s1 = sshll.u32 %s175_s0, 4  ;;  %s95_s1 = int_to_ptr.vmem [resolvable:$true] %s94_s1 }
  0x1e   :  { %v42_v12 = vadd.f32 %v41_v8, %v39_v7  ;;  %s147_s21 = scalar_lea.vmem %s95_s1, 384  ;;  %p152_p11 = scmp.lt.s32.totalorder %s95_s1, %s95_s1 }
  0x1f   :  { %v49_v2 = vsub.s32 0, %v44_v1  ;;  %v53_v3 = vsub.s32 1, %v44_v1  ;;  %v57_v4 = vsub.s32 2, %v44_v1  ;;  %v45_v5 = vcvt.s32.f32 %v44_v1  ;;  %p148_p10 = scmp.ne.s32.totalorder %s95_s1, %s147_s21  ;;  %p153_p12 = scmp.lt.s32.totalorder %s147_s21, %s147_s21 }
  0x21   :  { %v50_v9 = vrot.slane %v36_v6, %v49_v2  ;;  %v54_v10 = vrot.slane %v36_v6, %v53_v3  ;;  %v58_v11 = vrot.slane %v36_v6, %v57_v4  ;;  %v69_v16 = vrot.slane %v42_v12, %v49_v2  ;;  %p154_p13 = por %p153_p12, %p152_p11 }
  0x22   :  { %v73_v17 = vrot.slane %v42_v12, %v53_v3  ;;  %v77_v18 = vrot.slane %v42_v12, %v57_v4 }
  0x23   :  { %v62_v13 = vmul.f32 %v50_v9, %v45_v5  ;;  %v63_v14 = vmul.f32 %v54_v10, %v45_v5  ;;  %v64_v15 = vmul.f32 %v58_v11, %v45_v5  ;;  %p155_p0 = pnand %p154_p13, %p148_p10 }
  0x25   :  { %v81_v19 = vadd.f32 %v69_v16, %v62_v13  ;;  %v82_v20 = vadd.f32 %v73_v17, %v63_v14  ;;  %v83_v21 = vadd.f32 %v77_v18, %v64_v15 }
  0x27   :  { %84 = vst [vmem:[#allocation7] sm:$0xff] %v81_v19  ;;  %85 = vst [vmem:[#allocation7 + $0x8] sm:$0xff] %v82_v20 }
  0x28   :  { %87 = vst.msk [vmem:[#allocation7 + $0x10] sm:$0xff] %vm86_vm0, %v83_v21 }
  0x29   :  { %158 = shalt.err (!%p155_p0)
}
  0x2a   :  { %97 = dma.vmem_to_hbm [thread:$0]  %s95_s1, 384, %s202_s2, [#allocation4]  }
  0x2b   :  { %171 = dma.done.wait [#allocation4], 384  }
  0x2c   :  { %172 = vsyncadd [#allocation4], 4294966912 }
  0x2d   :  { %101 = vsyncpa [#allocation3], 1 }
  0x2e   :  { %102 = vsyncpa [#allocation6], 1 }
  0x2f   :  { %103 = vsyncpa [#allocation4], 1 }

</bundles_post_ra>
